<compile_context>
chip_gen: v7x
topology: tpu7x:2x2x1
jax: 0.10.0
libtpu: 0.0.40
codegen_flags: <defaults>
</compile_context>

<pallas_src>
import jax
import jax.numpy as jnp
from jax.experimental import pallas as pl
from jax.experimental.pallas import tpu as pltpu


def predictor_kernel(x_ref, w1_ref, b1_ref, g1_ref, be1_ref,
                     w2_ref, b2_ref, g2_ref, be2_ref,
                     wl_ref, bl_ref, out_ref):
    bpb, T, H = x_ref.shape                   # batches-per-block, time, hidden
    R = bpb * T
    x = x_ref[...].reshape(R, H)              # flatten batch*time into rows

    # Column masks guarding the conv halo at batch boundaries; only needed
    # when more than one batch is packed per block.  Computed ONCE as (R, 1)
    # columns and reused by both convs.
    if bpb > 1:
        tpos = jax.lax.broadcasted_iota(jnp.int32, (bpb, T, 1), 1).reshape(R, 1)
        m_prev = tpos != 0                    # row has a valid t-1 neighbour
        m_next = tpos != (T - 1)              # row has a valid t+1 neighbour

    zero_row = jnp.zeros((1, H), jnp.float32)

    def conv_relu(v, w_ref, b_ref):
        # y[t] = W0 x[t-1] + W1 x[t] + W2 x[t+1] + b   (zero 'same' padding).
        # Row shifts commute with right-matmul, so shift the matmul OUTPUTS:
        # no lane-axis concatenation of the input is required.
        u0 = jnp.dot(v, w_ref[0], preferred_element_type=jnp.float32)  # tap t-1
        u1 = jnp.dot(v, w_ref[1], preferred_element_type=jnp.float32)  # tap t
        u2 = jnp.dot(v, w_ref[2], preferred_element_type=jnp.float32)  # tap t+1
        u0s = jnp.concatenate([zero_row, u0[:-1, :]], axis=0)          # u0[t-1]
        u2s = jnp.concatenate([u2[1:, :], zero_row], axis=0)           # u2[t+1]
        if bpb > 1:
            u0s = jnp.where(m_prev, u0s, 0.0)
            u2s = jnp.where(m_next, u2s, 0.0)
        return jnp.maximum(u0s + u1 + u2s + b_ref[...], 0.0)

    def layernorm(v, g_ref, b_ref, eps=1e-5):
        mu = jnp.mean(v, axis=-1, keepdims=True)
        vc = v - mu
        var = jnp.mean(vc * vc, axis=-1, keepdims=True)
        return vc * jax.lax.rsqrt(var + eps) * g_ref[...] + b_ref[...]

    y = layernorm(conv_relu(x, w1_ref, b1_ref), g1_ref, be1_ref)
    y = layernorm(conv_relu(y, w2_ref, b2_ref), g2_ref, be2_ref)

    # Final projection mixes over TIME (valid because T == hidden_size):
    #   out[b, h] = sum_t wl[t] * y[b, t, h] + bl
    # VPU multiply + sublane reduce; scalar bias read from SMEM.
    wl_col = wl_ref[...]                                          # (T, 1)
    out = jnp.sum(y.reshape(bpb, T, H) * wl_col[None, :, :], axis=1)
    out_ref[...] = (out + bl_ref[0]).astype(out_ref.dtype)        # (bpb, H)


def _default_batch_blocks(B):
    """Split the batch 2-way on dual-TensorCore chips (v7x); otherwise run the
    whole batch in a single grid step (v5e/v6e have one TC, so extra grid
    steps only add per-step pipeline overhead)."""
    try:
        kind = jax.devices()[0].device_kind.lower()
    except Exception:
        kind = ""
    if B >= 2 and B % 2 == 0 and "v7" in kind:
        return 2
    return 1


def predictor_forward(x, params, num_batch_blocks=None):
    """x: (B, T, H) float32, params in torch Predictor layout.  Returns (B, H)."""
    B, T, H = x.shape
    # The module's final nn.Linear(hidden, 1) mixes over the time axis, which
    # only type-checks when T == hidden_size (faithful to the PyTorch code).
    assert T == H, f"Predictor requires seq_len == hidden_size, got T={T}, H={H}"
    w1, b1, g1, be1, w2, b2, g2, be2, wl, bl = params

    # Conv weights: torch (H_out, H_in, K) -> per-tap stack (K, H_in, H_out)
    # so each tap is a plain (R, H) x (H, H) matmul with a static first-axis
    # index inside the kernel.
    w1s = jnp.transpose(w1, (2, 1, 0))        # (3, H, H)
    w2s = jnp.transpose(w2, (2, 1, 0))        # (3, H, H)
    b1p, b2p = b1.reshape(1, H), b2.reshape(1, H)
    g1p, be1p = g1.reshape(1, H), be1.reshape(1, H)
    g2p, be2p = g2.reshape(1, H), be2.reshape(1, H)
    wlp = wl.reshape(H, 1)                    # (T, 1) column of time weights
    blp = bl.reshape(1)                       # scalar bias -> SMEM

    n_blk = (num_batch_blocks if num_batch_blocks is not None
             else _default_batch_blocks(B))
    assert B % n_blk == 0
    bpb = B // n_blk

    def const(shp):
        return pl.BlockSpec(shp, lambda *_: (0,) * len(shp))

    # TODO(synk): for production-length T, tile the time axis with a 1-frame
    # halo and accumulate the time projection across T-blocks (v7x VMEM is
    # only 64 MiB); at these small shapes a full-T block fits comfortably.
    return pl.pallas_call(
        predictor_kernel,
        out_shape=jax.ShapeDtypeStruct((B, H), x.dtype),
        grid_spec=pltpu.PrefetchScalarGridSpec(
            num_scalar_prefetch=0,
            grid=(n_blk,),
            in_specs=[
                pl.BlockSpec((bpb, T, H), lambda i: (i, 0, 0)),     # x
                const((3, H, H)), const((1, H)),                    # conv1 taps, bias
                const((1, H)), const((1, H)),                       # ln1 gamma, beta
                const((3, H, H)), const((1, H)),                    # conv2 taps, bias
                const((1, H)), const((1, H)),                       # ln2 gamma, beta
                const((H, 1)),                                      # linear weight (time col)
                pl.BlockSpec(memory_space=pltpu.MemorySpace.SMEM),  # linear bias (scalar)
            ],
            out_specs=pl.BlockSpec((bpb, H), lambda i: (i, 0)),
        ),
        compiler_params=pltpu.CompilerParams(
            dimension_semantics=("parallel",)),
    )(x, w1s, b1p, g1p, be1p, w2s, b2p, g2p, be2p, wlp, blp)


def predictor_ref(x, params):
    """Pure-JAX reference mirroring the PyTorch forward exactly."""
    w1, b1, g1, be1, w2, b2, g2, be2, wl, bl = params

    def conv(x_bth, w, b):  # w: (H_out, H_in, 3)
        xp = jnp.pad(x_bth, ((0, 0), (1, 1), (0, 0)))
        y = (jnp.einsum('bth,oh->bto', xp[:, :-2], w[:, :, 0])
             + jnp.einsum('bth,oh->bto', xp[:, 1:-1], w[:, :, 1])
             + jnp.einsum('bth,oh->bto', xp[:, 2:], w[:, :, 2]))
        return y + b

    def ln(v, g, b, eps=1e-5):
        mu = v.mean(-1, keepdims=True)
        var = ((v - mu) ** 2).mean(-1, keepdims=True)
        return (v - mu) / jnp.sqrt(var + eps) * g + b

    y = jax.nn.relu(conv(x, w1, b1))
    y = ln(y, g1, be1)
    y = jax.nn.relu(conv(y, w2, b2))
    y = ln(y, g2, be2)
    yt = jnp.swapaxes(y, 1, 2)                       # (B, H, T)
    out = jnp.einsum('bht,ot->bho', yt, wl) + bl     # Linear over time axis
    return out[..., 0]                               # squeeze(-1) -> (B, H)


if __name__ == "__main__":
    B, H = 2, 32
    T = H  # the module's final linear requires seq_len == hidden_size
    key = jax.random.PRNGKey(0)
    ks = jax.random.split(key, 12)

    x = jax.random.normal(ks[0], (B, T, H), jnp.float32)
    params = (
        0.1 * jax.random.normal(ks[1], (H, H, 3), jnp.float32),   # conv1.weight
        0.1 * jax.random.normal(ks[2], (H,), jnp.float32),        # conv1.bias
        1.0 + 0.1 * jax.random.normal(ks[3], (H,), jnp.float32),  # ln1.weight
        0.05 * jax.random.normal(ks[4], (H,), jnp.float32),       # ln1.bias
        0.1 * jax.random.normal(ks[5], (H, H, 3), jnp.float32),   # conv2.weight
        0.1 * jax.random.normal(ks[6], (H,), jnp.float32),        # conv2.bias
        1.0 + 0.1 * jax.random.normal(ks[7], (H,), jnp.float32),  # ln2.weight
        0.05 * jax.random.normal(ks[8], (H,), jnp.float32),       # ln2.bias
        0.1 * jax.random.normal(ks[9], (1, H), jnp.float32),      # linear.weight
        0.1 * jax.random.normal(ks[10], (1,), jnp.float32),       # linear.bias
    )

    out = predictor_forward(x, params)
    out = jax.block_until_ready(out)

    ref = predictor_ref(x, params)
    assert out.shape == (B, H), out.shape
    assert jnp.allclose(out, ref, atol=1e-4, rtol=1e-4), \
        f"max abs err {jnp.max(jnp.abs(out - ref))}"
    print("KERNEL_OK")
</pallas_src>

<mosaic_0001>
module attributes {stable_mosaic.version = 11 : i64} {
  func.func @predictor_kernel(%arg0: i32, %arg1: memref<2x32x32xf32, #tpu.memory_space<vmem>>, %arg2: memref<3x32x32xf32, #tpu.memory_space<vmem>>, %arg3: memref<1x32xf32, #tpu.memory_space<vmem>>, %arg4: memref<1x32xf32, #tpu.memory_space<vmem>>, %arg5: memref<1x32xf32, #tpu.memory_space<vmem>>, %arg6: memref<3x32x32xf32, #tpu.memory_space<vmem>>, %arg7: memref<1x32xf32, #tpu.memory_space<vmem>>, %arg8: memref<1x32xf32, #tpu.memory_space<vmem>>, %arg9: memref<1x32xf32, #tpu.memory_space<vmem>>, %arg10: memref<32x1xf32, #tpu.memory_space<vmem>>, %arg11: memref<1xf32, #tpu.memory_space<smem>>, %arg12: memref<2x32xf32, #tpu.memory_space<vmem>>) attributes {dimension_semantics = [#tpu.dimension_semantics<parallel>], iteration_bounds = array<i64: 1>, scalar_prefetch = 0 : i64, scratch_operands = 0 : i64, tpu.core_type = #tpu.core_type<tc>, window_params = [{transform_indices = @transform_0, window_bounds = array<i64: 2, 32, 32>}, {pipeline_mode = #tpu.pipeline_mode<synchronous>, transform_indices = @transform_1, window_bounds = array<i64: 3, 32, 32>}, {pipeline_mode = #tpu.pipeline_mode<synchronous>, transform_indices = @transform_2, window_bounds = array<i64: 1, 32>}, {pipeline_mode = #tpu.pipeline_mode<synchronous>, transform_indices = @transform_3, window_bounds = array<i64: 1, 32>}, {pipeline_mode = #tpu.pipeline_mode<synchronous>, transform_indices = @transform_4, window_bounds = array<i64: 1, 32>}, {pipeline_mode = #tpu.pipeline_mode<synchronous>, transform_indices = @transform_5, window_bounds = array<i64: 3, 32, 32>}, {pipeline_mode = #tpu.pipeline_mode<synchronous>, transform_indices = @transform_6, window_bounds = array<i64: 1, 32>}, {pipeline_mode = #tpu.pipeline_mode<synchronous>, transform_indices = @transform_7, window_bounds = array<i64: 1, 32>}, {pipeline_mode = #tpu.pipeline_mode<synchronous>, transform_indices = @transform_8, window_bounds = array<i64: 1, 32>}, {pipeline_mode = #tpu.pipeline_mode<synchronous>, transform_indices = @transform_9, window_bounds = array<i64: 32, 1>}, {transform_indices = @transform_10, window_bounds = array<i64: 1>}, {transform_indices = @transform_11, window_bounds = array<i64: 2, 32>}]} {
    %c0 = arith.constant 0 : index
    %c0_0 = arith.constant 0 : index
    %c0_1 = arith.constant 0 : index
    %0 = vector.load %arg1[%c0, %c0_0, %c0_1] : memref<2x32x32xf32, #tpu.memory_space<vmem>>, vector<2x32x32xf32>
    %1 = vector.shape_cast %0 : vector<2x32x32xf32> to vector<64x32xf32>
    %2 = tpu.iota {dimensions = array<i32: 1>} : vector<2x32x1xi32>
    %3 = vector.shape_cast %2 : vector<2x32x1xi32> to vector<64x1xi32>
    %c0_i32 = arith.constant 0 : i32
    %4 = vector.broadcast %c0_i32 : i32 to vector<64x1xi32>
    %5 = arith.cmpi ne, %3, %4 : vector<64x1xi32>
    %c31_i32 = arith.constant 31 : i32
    %6 = vector.broadcast %c31_i32 : i32 to vector<64x1xi32>
    %7 = arith.cmpi ne, %3, %6 : vector<64x1xi32>
    %cst = arith.constant 0.000000e+00 : f32
    %8 = vector.broadcast %cst : f32 to vector<1x32xf32>
    %c0_2 = arith.constant 0 : index
    %c0_3 = arith.constant 0 : index
    %c0_4 = arith.constant 0 : index
    %9 = vector.load %arg2[%c0_2, %c0_3, %c0_4] : memref<3x32x32xf32, #tpu.memory_space<vmem>>, vector<1x32x32xf32>
    %10 = vector.shape_cast %9 : vector<1x32x32xf32> to vector<32x32xf32>
    %cst_5 = arith.constant dense<0.000000e+00> : vector<64x32xf32>
    %11 = tpu.matmul %1, %10, %cst_5 {dimension_numbers = #tpu.dot_dimension_numbers<[1], [0], [0], [1], [0, 0, 1, 1], [], []>} : vector<64x32xf32>, vector<32x32xf32>, vector<64x32xf32> -> vector<64x32xf32>
    %c1 = arith.constant 1 : index
    %c0_6 = arith.constant 0 : index
    %c0_7 = arith.constant 0 : index
    %12 = vector.load %arg2[%c1, %c0_6, %c0_7] : memref<3x32x32xf32, #tpu.memory_space<vmem>>, vector<1x32x32xf32>
    %13 = vector.shape_cast %12 : vector<1x32x32xf32> to vector<32x32xf32>
    %cst_8 = arith.constant dense<0.000000e+00> : vector<64x32xf32>
    %14 = tpu.matmul %1, %13, %cst_8 {dimension_numbers = #tpu.dot_dimension_numbers<[1], [0], [0], [1], [0, 0, 1, 1], [], []>} : vector<64x32xf32>, vector<32x32xf32>, vector<64x32xf32> -> vector<64x32xf32>
    %c2 = arith.constant 2 : index
    %c0_9 = arith.constant 0 : index
    %c0_10 = arith.constant 0 : index
    %15 = vector.load %arg2[%c2, %c0_9, %c0_10] : memref<3x32x32xf32, #tpu.memory_space<vmem>>, vector<1x32x32xf32>
    %16 = vector.shape_cast %15 : vector<1x32x32xf32> to vector<32x32xf32>
    %cst_11 = arith.constant dense<0.000000e+00> : vector<64x32xf32>
    %17 = tpu.matmul %1, %16, %cst_11 {dimension_numbers = #tpu.dot_dimension_numbers<[1], [0], [0], [1], [0, 0, 1, 1], [], []>} : vector<64x32xf32>, vector<32x32xf32>, vector<64x32xf32> -> vector<64x32xf32>
    %18 = vector.extract_strided_slice %11 {offsets = [0, 0], sizes = [63, 32], strides = [1, 1]} : vector<64x32xf32> to vector<63x32xf32>
    %19 = tpu.concatenate %8, %18 in 0 : vector<1x32xf32>, vector<63x32xf32> -> vector<64x32xf32>
    %20 = vector.extract_strided_slice %17 {offsets = [1, 0], sizes = [63, 32], strides = [1, 1]} : vector<64x32xf32> to vector<63x32xf32>
    %21 = tpu.concatenate %20, %8 in 0 : vector<63x32xf32>, vector<1x32xf32> -> vector<64x32xf32>
    %cst_12 = arith.constant 0.000000e+00 : f32
    %22 = vector.shape_cast %5 : vector<64x1xi1> to vector<64x1xi1>
    %23 = vector.broadcast %22 : vector<64x1xi1> to vector<64x32xi1>
    %24 = vector.broadcast %cst_12 : f32 to vector<64x32xf32>
    %25 = arith.select %23, %19, %24 : vector<64x32xi1>, vector<64x32xf32>
    %cst_13 = arith.constant 0.000000e+00 : f32
    %26 = vector.shape_cast %7 : vector<64x1xi1> to vector<64x1xi1>
    %27 = vector.broadcast %26 : vector<64x1xi1> to vector<64x32xi1>
    %28 = vector.broadcast %cst_13 : f32 to vector<64x32xf32>
    %29 = arith.select %27, %21, %28 : vector<64x32xi1>, vector<64x32xf32>
    %30 = arith.addf %25, %14 : vector<64x32xf32>
    %31 = arith.addf %30, %29 : vector<64x32xf32>
    %c0_14 = arith.constant 0 : index
    %c0_15 = arith.constant 0 : index
    %32 = vector.load %arg3[%c0_14, %c0_15] : memref<1x32xf32, #tpu.memory_space<vmem>>, vector<1x32xf32>
    %33 = vector.broadcast %32 : vector<1x32xf32> to vector<64x32xf32>
    %34 = arith.addf %31, %33 : vector<64x32xf32>
    %cst_16 = arith.constant 0.000000e+00 : f32
    %35 = vector.broadcast %cst_16 : f32 to vector<64x32xf32>
    %36 = arith.maximumf %34, %35 : vector<64x32xf32>
    %cst_17 = arith.constant dense<0.000000e+00> : vector<64xf32>
    %37 = vector.multi_reduction <add>, %36, %cst_17 [1] : vector<64x32xf32> to vector<64xf32>
    %38 = vector.shape_cast %37 : vector<64xf32> to vector<64x1xf32>
    %cst_18 = arith.constant 3.200000e+01 : f32
    %39 = vector.broadcast %cst_18 : f32 to vector<64x1xf32>
    %40 = arith.divf %38, %39 : vector<64x1xf32>
    %41 = vector.broadcast %40 : vector<64x1xf32> to vector<64x32xf32>
    %42 = arith.subf %36, %41 : vector<64x32xf32>
    %43 = arith.mulf %42, %42 : vector<64x32xf32>
    %cst_19 = arith.constant dense<0.000000e+00> : vector<64xf32>
    %44 = vector.multi_reduction <add>, %43, %cst_19 [1] : vector<64x32xf32> to vector<64xf32>
    %45 = vector.shape_cast %44 : vector<64xf32> to vector<64x1xf32>
    %cst_20 = arith.constant 3.200000e+01 : f32
    %46 = vector.broadcast %cst_20 : f32 to vector<64x1xf32>
    %47 = arith.divf %45, %46 : vector<64x1xf32>
    %cst_21 = arith.constant 9.99999974E-6 : f32
    %48 = vector.broadcast %cst_21 : f32 to vector<64x1xf32>
    %49 = arith.addf %47, %48 : vector<64x1xf32>
    %50 = math.rsqrt %49 : vector<64x1xf32>
    %51 = vector.broadcast %50 : vector<64x1xf32> to vector<64x32xf32>
    %52 = arith.mulf %42, %51 : vector<64x32xf32>
    %c0_22 = arith.constant 0 : index
    %c0_23 = arith.constant 0 : index
    %53 = vector.load %arg4[%c0_22, %c0_23] : memref<1x32xf32, #tpu.memory_space<vmem>>, vector<1x32xf32>
    %54 = vector.broadcast %53 : vector<1x32xf32> to vector<64x32xf32>
    %55 = arith.mulf %52, %54 : vector<64x32xf32>
    %c0_24 = arith.constant 0 : index
    %c0_25 = arith.constant 0 : index
    %56 = vector.load %arg5[%c0_24, %c0_25] : memref<1x32xf32, #tpu.memory_space<vmem>>, vector<1x32xf32>
    %57 = vector.broadcast %56 : vector<1x32xf32> to vector<64x32xf32>
    %58 = arith.addf %55, %57 : vector<64x32xf32>
    %c0_26 = arith.constant 0 : index
    %c0_27 = arith.constant 0 : index
    %c0_28 = arith.constant 0 : index
    %59 = vector.load %arg6[%c0_26, %c0_27, %c0_28] : memref<3x32x32xf32, #tpu.memory_space<vmem>>, vector<1x32x32xf32>
    %60 = vector.shape_cast %59 : vector<1x32x32xf32> to vector<32x32xf32>
    %cst_29 = arith.constant dense<0.000000e+00> : vector<64x32xf32>
    %61 = tpu.matmul %58, %60, %cst_29 {dimension_numbers = #tpu.dot_dimension_numbers<[1], [0], [0], [1], [0, 0, 1, 1], [], []>} : vector<64x32xf32>, vector<32x32xf32>, vector<64x32xf32> -> vector<64x32xf32>
    %c1_30 = arith.constant 1 : index
    %c0_31 = arith.constant 0 : index
    %c0_32 = arith.constant 0 : index
    %62 = vector.load %arg6[%c1_30, %c0_31, %c0_32] : memref<3x32x32xf32, #tpu.memory_space<vmem>>, vector<1x32x32xf32>
    %63 = vector.shape_cast %62 : vector<1x32x32xf32> to vector<32x32xf32>
    %cst_33 = arith.constant dense<0.000000e+00> : vector<64x32xf32>
    %64 = tpu.matmul %58, %63, %cst_33 {dimension_numbers = #tpu.dot_dimension_numbers<[1], [0], [0], [1], [0, 0, 1, 1], [], []>} : vector<64x32xf32>, vector<32x32xf32>, vector<64x32xf32> -> vector<64x32xf32>
    %c2_34 = arith.constant 2 : index
    %c0_35 = arith.constant 0 : index
    %c0_36 = arith.constant 0 : index
    %65 = vector.load %arg6[%c2_34, %c0_35, %c0_36] : memref<3x32x32xf32, #tpu.memory_space<vmem>>, vector<1x32x32xf32>
    %66 = vector.shape_cast %65 : vector<1x32x32xf32> to vector<32x32xf32>
    %cst_37 = arith.constant dense<0.000000e+00> : vector<64x32xf32>
    %67 = tpu.matmul %58, %66, %cst_37 {dimension_numbers = #tpu.dot_dimension_numbers<[1], [0], [0], [1], [0, 0, 1, 1], [], []>} : vector<64x32xf32>, vector<32x32xf32>, vector<64x32xf32> -> vector<64x32xf32>
    %68 = vector.extract_strided_slice %61 {offsets = [0, 0], sizes = [63, 32], strides = [1, 1]} : vector<64x32xf32> to vector<63x32xf32>
    %69 = tpu.concatenate %8, %68 in 0 : vector<1x32xf32>, vector<63x32xf32> -> vector<64x32xf32>
    %70 = vector.extract_strided_slice %67 {offsets = [1, 0], sizes = [63, 32], strides = [1, 1]} : vector<64x32xf32> to vector<63x32xf32>
    %71 = tpu.concatenate %70, %8 in 0 : vector<63x32xf32>, vector<1x32xf32> -> vector<64x32xf32>
    %cst_38 = arith.constant 0.000000e+00 : f32
    %72 = vector.shape_cast %5 : vector<64x1xi1> to vector<64x1xi1>
    %73 = vector.broadcast %72 : vector<64x1xi1> to vector<64x32xi1>
    %74 = vector.broadcast %cst_38 : f32 to vector<64x32xf32>
    %75 = arith.select %73, %69, %74 : vector<64x32xi1>, vector<64x32xf32>
    %cst_39 = arith.constant 0.000000e+00 : f32
    %76 = vector.shape_cast %7 : vector<64x1xi1> to vector<64x1xi1>
    %77 = vector.broadcast %76 : vector<64x1xi1> to vector<64x32xi1>
    %78 = vector.broadcast %cst_39 : f32 to vector<64x32xf32>
    %79 = arith.select %77, %71, %78 : vector<64x32xi1>, vector<64x32xf32>
    %80 = arith.addf %75, %64 : vector<64x32xf32>
    %81 = arith.addf %80, %79 : vector<64x32xf32>
    %c0_40 = arith.constant 0 : index
    %c0_41 = arith.constant 0 : index
    %82 = vector.load %arg7[%c0_40, %c0_41] : memref<1x32xf32, #tpu.memory_space<vmem>>, vector<1x32xf32>
    %83 = vector.broadcast %82 : vector<1x32xf32> to vector<64x32xf32>
    %84 = arith.addf %81, %83 : vector<64x32xf32>
    %cst_42 = arith.constant 0.000000e+00 : f32
    %85 = vector.broadcast %cst_42 : f32 to vector<64x32xf32>
    %86 = arith.maximumf %84, %85 : vector<64x32xf32>
    %cst_43 = arith.constant dense<0.000000e+00> : vector<64xf32>
    %87 = vector.multi_reduction <add>, %86, %cst_43 [1] : vector<64x32xf32> to vector<64xf32>
    %88 = vector.shape_cast %87 : vector<64xf32> to vector<64x1xf32>
    %cst_44 = arith.constant 3.200000e+01 : f32
    %89 = vector.broadcast %cst_44 : f32 to vector<64x1xf32>
    %90 = arith.divf %88, %89 : vector<64x1xf32>
    %91 = vector.broadcast %90 : vector<64x1xf32> to vector<64x32xf32>
    %92 = arith.subf %86, %91 : vector<64x32xf32>
    %93 = arith.mulf %92, %92 : vector<64x32xf32>
    %cst_45 = arith.constant dense<0.000000e+00> : vector<64xf32>
    %94 = vector.multi_reduction <add>, %93, %cst_45 [1] : vector<64x32xf32> to vector<64xf32>
    %95 = vector.shape_cast %94 : vector<64xf32> to vector<64x1xf32>
    %cst_46 = arith.constant 3.200000e+01 : f32
    %96 = vector.broadcast %cst_46 : f32 to vector<64x1xf32>
    %97 = arith.divf %95, %96 : vector<64x1xf32>
    %cst_47 = arith.constant 9.99999974E-6 : f32
    %98 = vector.broadcast %cst_47 : f32 to vector<64x1xf32>
    %99 = arith.addf %97, %98 : vector<64x1xf32>
    %100 = math.rsqrt %99 : vector<64x1xf32>
    %101 = vector.broadcast %100 : vector<64x1xf32> to vector<64x32xf32>
    %102 = arith.mulf %92, %101 : vector<64x32xf32>
    %c0_48 = arith.constant 0 : index
    %c0_49 = arith.constant 0 : index
    %103 = vector.load %arg8[%c0_48, %c0_49] : memref<1x32xf32, #tpu.memory_space<vmem>>, vector<1x32xf32>
    %104 = vector.broadcast %103 : vector<1x32xf32> to vector<64x32xf32>
    %105 = arith.mulf %102, %104 : vector<64x32xf32>
    %c0_50 = arith.constant 0 : index
    %c0_51 = arith.constant 0 : index
    %106 = vector.load %arg9[%c0_50, %c0_51] : memref<1x32xf32, #tpu.memory_space<vmem>>, vector<1x32xf32>
    %107 = vector.broadcast %106 : vector<1x32xf32> to vector<64x32xf32>
    %108 = arith.addf %105, %107 : vector<64x32xf32>
    %c0_52 = arith.constant 0 : index
    %c0_53 = arith.constant 0 : index
    %109 = vector.load %arg10[%c0_52, %c0_53] : memref<32x1xf32, #tpu.memory_space<vmem>>, vector<32x1xf32>
    %110 = vector.shape_cast %108 : vector<64x32xf32> to vector<2x32x32xf32>
    %111 = vector.shape_cast %109 : vector<32x1xf32> to vector<1x32x1xf32>
    %112 = vector.broadcast %111 : vector<1x32x1xf32> to vector<2x32x32xf32>
    %113 = arith.mulf %110, %112 : vector<2x32x32xf32>
    %cst_54 = arith.constant dense<0.000000e+00> : vector<2x32xf32>
    %114 = vector.multi_reduction <add>, %113, %cst_54 [1] : vector<2x32x32xf32> to vector<2x32xf32>
    %c0_55 = arith.constant 0 : index
    %115 = memref.load %arg11[%c0_55] : memref<1xf32, #tpu.memory_space<smem>>
    %116 = vector.broadcast %115 : f32 to vector<2x32xf32>
    %117 = arith.addf %114, %116 : vector<2x32xf32>
    %c0_56 = arith.constant 0 : index
    %c0_57 = arith.constant 0 : index
    %118 = vector.load %arg12[%c0_56, %c0_57] : memref<2x32xf32, #tpu.memory_space<vmem>>, vector<2x32xf32>
    tpu.vector_store %arg12[%c0_56, %c0_57], %117 {strides = array<i32>} : memref<2x32xf32, #tpu.memory_space<vmem>>, vector<2x32xf32>,
    return
  }
  func.func @transform_0(%arg0: i32) -> (i32, i32, i32) {
    %c0_i32 = arith.constant 0 : i32
    %c0_i32_0 = arith.constant 0 : i32
    %c0_i32_1 = arith.constant 0 : i32
    return %arg0, %c0_i32, %c0_i32_0 : i32, i32, i32
  }
  func.func @transform_1(%arg0: i32) -> (i32, i32, i32) {
    %c0_i32 = arith.constant 0 : i32
    %c0_i32_0 = arith.constant 0 : i32
    %c0_i32_1 = arith.constant 0 : i32
    %c0_i32_2 = arith.constant 0 : i32
    return %c0_i32, %c0_i32_0, %c0_i32_1 : i32, i32, i32
  }
  func.func @transform_2(%arg0: i32) -> (i32, i32) {
    %c0_i32 = arith.constant 0 : i32
    %c0_i32_0 = arith.constant 0 : i32
    %c0_i32_1 = arith.constant 0 : i32
    return %c0_i32, %c0_i32_0 : i32, i32
  }
  func.func @transform_3(%arg0: i32) -> (i32, i32) {
    %c0_i32 = arith.constant 0 : i32
    %c0_i32_0 = arith.constant 0 : i32
    %c0_i32_1 = arith.constant 0 : i32
    return %c0_i32, %c0_i32_0 : i32, i32
  }
  func.func @transform_4(%arg0: i32) -> (i32, i32) {
    %c0_i32 = arith.constant 0 : i32
    %c0_i32_0 = arith.constant 0 : i32
    %c0_i32_1 = arith.constant 0 : i32
    return %c0_i32, %c0_i32_0 : i32, i32
  }
  func.func @transform_5(%arg0: i32) -> (i32, i32, i32) {
    %c0_i32 = arith.constant 0 : i32
    %c0_i32_0 = arith.constant 0 : i32
    %c0_i32_1 = arith.constant 0 : i32
    %c0_i32_2 = arith.constant 0 : i32
    return %c0_i32, %c0_i32_0, %c0_i32_1 : i32, i32, i32
  }
  func.func @transform_6(%arg0: i32) -> (i32, i32) {
    %c0_i32 = arith.constant 0 : i32
    %c0_i32_0 = arith.constant 0 : i32
    %c0_i32_1 = arith.constant 0 : i32
    return %c0_i32, %c0_i32_0 : i32, i32
  }
  func.func @transform_7(%arg0: i32) -> (i32, i32) {
    %c0_i32 = arith.constant 0 : i32
    %c0_i32_0 = arith.constant 0 : i32
    %c0_i32_1 = arith.constant 0 : i32
    return %c0_i32, %c0_i32_0 : i32, i32
  }
  func.func @transform_8(%arg0: i32) -> (i32, i32) {
    %c0_i32 = arith.constant 0 : i32
    %c0_i32_0 = arith.constant 0 : i32
    %c0_i32_1 = arith.constant 0 : i32
    return %c0_i32, %c0_i32_0 : i32, i32
  }
  func.func @transform_9(%arg0: i32) -> (i32, i32) {
    %c0_i32 = arith.constant 0 : i32
    %c0_i32_0 = arith.constant 0 : i32
    %c0_i32_1 = arith.constant 0 : i32
    return %c0_i32, %c0_i32_0 : i32, i32
  }
  func.func @transform_10(%arg0: i32) -> i32 {
    %c0_i32 = arith.constant 0 : i32
    %c0_i32_0 = arith.constant 0 : i32
    return %c0_i32 : i32
  }
  func.func @transform_11(%arg0: i32) -> (i32, i32) {
    %c0_i32 = arith.constant 0 : i32
    %c0_i32_0 = arith.constant 0 : i32
    return %arg0, %c0_i32 : i32, i32
  }
}

</mosaic_0001>

<bundles_post_ra>
// kernel: tpu_custom_call.1
= control target key start
LH: loop header
LB: loop body
LE: loop exit
PB: predicated region body
PF: predicated region fallthrough
CT: control target
= control target key end

     0   :  { %17 = vsyncpa [#allocation4], 0  ;;  %s2245_s0 = inlined_call_operand.hbm [shape: f32[2,32,32], index: 0, kind: input, shape index: {}]   ;;  %s2246_s1 = inlined_call_operand.hbm [shape: f32[3,32,32], index: 1, kind: input, shape index: {}]   ;;  %s2247_s2 = inlined_call_operand.vmem [shape: f32[1,32], index: 2, kind: input, shape index: {}]   ;;  %s2248_s3 = inlined_call_operand.vmem [shape: f32[1,32], index: 3, kind: input, shape index: {}]   ;;  %s2249_s4 = inlined_call_operand.vmem [shape: f32[1,32], index: 4, kind: input, shape index: {}]   ;;  %s2250_s5 = inlined_call_operand.hbm [shape: f32[3,32,32], index: 5, kind: input, shape index: {}]   ;;  %s2251_s6 = inlined_call_operand.vmem [shape: f32[1,32], index: 6, kind: input, shape index: {}]   ;;  %s2252_s7 = inlined_call_operand.vmem [shape: f32[1,32], index: 7, kind: input, shape index: {}]   ;;  %s2253_s8 = inlined_call_operand.vmem [shape: f32[1,32], index: 8, kind: input, shape index: {}]   ;;  %s2254_s9 = inlined_call_operand.vmem [shape: f32[32,1], index: 9, kind: input, shape index: {}]   ;;  %s2255_s10 = inlined_call_operand.<no memory space> [shape: f32[1], index: 10, kind: input, shape index: {}]   ;;  %s2256_s11 = inlined_call_operand.hbm [shape: f32[2,32], index: 11, kind: output, shape index: {}]  }
   0x1   :  { %18 = vsyncpa [#allocation7], 0 }
   0x2   :  { %19 = vsyncpa [#allocation5], 0  ;;  %s1848_s17 = smov [#allocation6]   ;;  %s1849_s19 = smov [#allocation3]  }
   0x3   :  { %s37_s18 = sshll.u32 %s1848_s17, 4  ;;  %s25_s20 = sshll.u32 %s1849_s19, 4  ;;  %s38_s18 = int_to_ptr.vmem [resolvable:$true] %s37_s18  ;;  %s1915_s20 = int_to_ptr.vmem [resolvable:$true] %s25_s20 }
   0x4   :  { %s1754_s23 = scalar_lea.hbm %s2246_s1, 1536 }
   0x5   :  { %p1755_p0 = scmp.ne.s32.totalorder %s2246_s1, %s1754_s23  ;;  %p1758_p1 = scmp.lt.u32.totalorder %s1754_s23, %s2246_s1 }
   0x7   :  { %p1760_p2 = pnand %p1758_p1, %p1755_p0 }
   0x9   :  { %1763 = shalt.err (!%p1760_p2)
}
   0xa   :  { %s1764_s28 = scalar_lea.vmem %s38_s18, 1536  ;;  %p1769_p4 = scmp.lt.s32.totalorder %s38_s18, %s38_s18 }
   0xb   :  { %p1765_p3 = scmp.ne.s32.totalorder %s38_s18, %s1764_s28  ;;  %p1770_p5 = scmp.lt.s32.totalorder %s1764_s28, %s1764_s28 }
   0xd   :  { %p1771_p6 = por %p1770_p5, %p1769_p4 }
   0xf   :  { %p1772_p7 = pnand %p1771_p6, %p1765_p3 }
  0x11   :  { %1775 = shalt.err (!%p1772_p7)
}
  0x12   :  { %s1850_s29 = smov 128   ;;  %s1851_s30 = smov 8  }
  0x13   :  { %43 = dma.hbm_to_vmem [thread:$0]  %s2246_s1, 1536, %s38_s18, [#allocation7], %s1850_s29, %s1850_s29, %s1851_s30  }
  0x14   :  { %s1776_s16 = scalar_lea.hbm %s2245_s0, 1024 }
  0x15   :  { %p1777_p8 = scmp.ne.s32.totalorder %s2245_s0, %s1776_s16  ;;  %p1780_p9 = scmp.lt.u32.totalorder %s1776_s16, %s2245_s0 }
  0x17   :  { %p1782_p10 = pnand %p1780_p9, %p1777_p8 }
  0x19   :  { %1785 = shalt.err (!%p1782_p10)
}
  0x1a   :  { %s1786_s23 = scalar_lea.vmem %s1915_s20, 1024  ;;  %p1791_p12 = scmp.lt.s32.totalorder %s1915_s20, %s1915_s20 }
  0x1b   :  { %p1787_p11 = scmp.ne.s32.totalorder %s1915_s20, %s1786_s23  ;;  %p1792_p13 = scmp.lt.s32.totalorder %s1786_s23, %s1786_s23 }
  0x1d   :  { %p1793_p0 = por %p1792_p13, %p1791_p12 }
  0x1f   :  { %p1794_p1 = pnand %p1793_p0, %p1787_p11 }
  0x21   :  { %1797 = shalt.err (!%p1794_p1)
}
  0x22   :  { %31 = dma.hbm_to_vmem [thread:$0]  %s2245_s0, 1024, %s1915_s20, [#allocation4], %s1850_s29, %s1850_s29, %s1851_s30  }
  0x23   :  { %s1852_s24 = smov [#allocation8]   ;;  %s1798_s28 = scalar_lea.hbm %s2250_s5, 1536 }
  0x24   :  { %s55_s25 = sshll.u32 %s1852_s24, 4  ;;  %p1799_p2 = scmp.ne.s32.totalorder %s2250_s5, %s1798_s28  ;;  %s56_s25 = int_to_ptr.vmem [resolvable:$true] %s55_s25 }
  0x25   :  { %p1802_p3 = scmp.lt.u32.totalorder %s1798_s28, %s2250_s5 }
  0x27   :  { %p1804_p4 = pnand %p1802_p3, %p1799_p2 }
  0x29   :  { %1807 = shalt.err (!%p1804_p4)
}
  0x2a   :  { %s1808_s16 = scalar_lea.vmem %s56_s25, 1536  ;;  %p1813_p6 = scmp.lt.s32.totalorder %s56_s25, %s56_s25 }
  0x2b   :  { %p1809_p5 = scmp.ne.s32.totalorder %s56_s25, %s1808_s16  ;;  %p1814_p7 = scmp.lt.s32.totalorder %s1808_s16, %s1808_s16 }
  0x2d   :  { %p1815_p8 = por %p1814_p7, %p1813_p6 }
  0x2f   :  { %p1816_p9 = pnand %p1815_p8, %p1809_p5 }
  0x31   :  { %1819 = shalt.err (!%p1816_p9)
}
  0x32   :  { %61 = dma.hbm_to_vmem [thread:$0]  %s2250_s5, 1536, %s56_s25, [#allocation7], %s1850_s29, %s1850_s29, %s1851_s30  }
  0x33   :  { %1842 = dma.done.wait [#allocation4], 1024  }
  0x34   :  { %1843 = vsyncadd [#allocation4], 4294966272 }
  0x35   :  { %1844 = dma.done.wait [#allocation7], 3072  }
  0x36   :  { %1845 = vsyncadd [#allocation7], 4294964224  ;;  %v102_v0 = vld [vmem:[#allocation6] sm:$0xff]  ;;  %v103_v1 = vld [vmem:[#allocation6 + $0x8] sm:$0xff]  ;;  %vm106_vm0 = vcmask 261120   ;;  %v89_v26 = vlaneseq  ;;  %vm464_vm1 = vcmask 1040384  }
  0x37   :  { %v237_v2 = vld [vmem:[#allocation6 + $0x20] sm:$0xff]  ;;  %v1665_v3 = vpack.c.bf16 %v103_v1, %v102_v0  ;;  %v238_v4 = vld [vmem:[#allocation6 + $0x28] sm:$0xff]  ;;  %v104_v5 = vld [vmem:[#allocation6 + $0x10] sm:$0xff]  ;;  %vm497_vm3 = vcmask 1046528   ;;  %s1854_s12 = smov [#allocation9]   ;;  %vm1398_vm5 = vcmask 1041409  }
  0x38   :  { %v105_v6 = vld [vmem:[#allocation6 + $0x18] sm:$0xff]  ;;  %v1673_v7 = vpack.c.bf16 %v238_v4, %v237_v2  ;;  %v81_v9 = vld [vmem:[#allocation3] sm:$0xff]  ;;  %v239_v10 = vld [vmem:[#allocation6 + $0x30] sm:$0xff]  ;;  %v1991_v27 = vshrl.u32 %v89_v26, 7  ;;  %s1409_s13 = sshll.u32 %s1854_s12, 4  ;;  %vm1401_vm6 = vcmask 254976   ;;  %s1410_s13 = int_to_ptr.vmem [resolvable:$true] %s1409_s13 }
  0x39   :  { %v1669_v8 = vpack.c.bf16 %v105_v6, %v104_v5  ;;  %v240_v11 = vld [vmem:[#allocation6 + $0x38] sm:$0xff]  ;;  %1666 = vmatprep.subr.bf16.mxu0 %v1665_v3  ;;  %1553 = vmatprep.mubr.msk.f32.mxu0 %vm106_vm0, %v81_v9  ;;  %v347_v13 = vld [vmem:[#allocation6 + $0x40] sm:$0xff]  ;;  %v348_v14 = vld [vmem:[#allocation6 + $0x48] sm:$0xff]  ;;  %s1820_s14 = scalar_lea.vmem %s1410_s13, 32  ;;  %p1825_p11 = scmp.lt.s32.totalorder %s1410_s13, %s1410_s13 }
  0x3a   :  { %v1677_v12 = vpack.c.bf16 %v240_v11, %v239_v10  ;;  %1668 = vmatpush3.bf16.msra.mxu0 %v1665_v3  ;;  %1674 = vmatprep.subr.bf16.mxu1 %v1673_v7  ;;  %v1681_v15 = vpack.c.bf16 %v348_v14, %v347_v13  ;;  %v349_v16 = vld [vmem:[#allocation6 + $0x50] sm:$0xff]  ;;  %v350_v17 = vld [vmem:[#allocation6 + $0x58] sm:$0xff]  ;;  %v82_v18 = vld [vmem:[#allocation3 + $0x8] sm:$0xff]  ;;  %vm94_vm2 = vcmp.ne.s32.totalorder %v1991_v27, 0  ;;  %p1821_p10 = scmp.ne.s32.totalorder %s1410_s13, %s1820_s14  ;;  %p1826_p12 = scmp.lt.s32.totalorder %s1820_s14, %s1820_s14 }
  0x3b   :  { %1670 = vmatprep.subr.bf16.mxu0 %v1669_v8  ;;  %1676 = vmatpush3.bf16.msra.mxu1 %v1673_v7  ;;  %v83_v19 = vld [vmem:[#allocation3 + $0x10] sm:$0xff]  ;;  %v1685_v20 = vpack.c.bf16 %v350_v17, %v349_v16  ;;  %v84_v21 = vld [vmem:[#allocation3 + $0x18] sm:$0xff]  ;;  %v85_v22 = vld [vmem:[#allocation3 + $0x20] sm:$0xff] }
  0x3c   :  { %1678 = vmatprep.subr.bf16.mxu1 %v1677_v12  ;;  %1573 = vmatprep.mubr.msk.f32.mxu1 %vm106_vm0, %v81_v9  ;;  %v86_v23 = vld [vmem:[#allocation3 + $0x28] sm:$0xff]  ;;  %v87_v24 = vld [vmem:[#allocation3 + $0x30] sm:$0xff]  ;;  %v88_v25 = vld [vmem:[#allocation3 + $0x38] sm:$0xff]  ;;  %p1827_p13 = por %p1826_p12, %p1825_p11 }
  0x3e   :  { %1672 = vmatpush3.bf16.msra.mxu0 %v1669_v8  ;;  %p1828_p0 = pnand %p1827_p13, %p1821_p10 }
  0x3f   :  { %1680 = vmatpush3.bf16.msra.mxu1 %v1677_v12  ;;  %1682 = vmatprep.subr.bf16.mxu0 %v1681_v15  ;;  %v1443_v12 = vld [vmem:[%s2247_s2] ss:$0 sm:$0xff] }
  0x41   :  { %1554 = vmatmul.mubr.msk.f32.vlgmr.msra.gmra.mrb[0].mxu0 %vm106_vm0, %v82_v18 }
  0x42   :  { %1684 = vmatpush3.bf16.msra.mxu0 %v1681_v15  ;;  %1556 = vmatprep.mubr.msk.f32.mxu0 %vm106_vm0, %v83_v19 }
  0x43   :  { %1574 = vmatmul.mubr.msk.f32.vlgmr.msra.gmra.mrb[0].mxu1 %vm106_vm0, %v82_v18  ;;  %1686 = vmatprep.subr.bf16.mxu0 %v1685_v20 }
  0x44   :  { %1576 = vmatprep.mubr.msk.f32.mxu1 %vm106_vm0, %v83_v19 }
  0x45   :  { %1557 = vmatmul.mubr.msk.f32.gmra.mrb[2].mxu0 %vm106_vm0, %v84_v21 }
  0x46   :  { %1559 = vmatprep.mubr.msk.f32.mxu0 %vm106_vm0, %v85_v22  ;;  %1688 = vmatpush3.bf16.msra.mxu0 %v1685_v20 }
  0x47   :  { %1577 = vmatmul.mubr.msk.f32.gmra.mrb[2].mxu1 %vm106_vm0, %v84_v21 }
  0x48   :  { %1579 = vmatprep.mubr.msk.f32.mxu1 %vm106_vm0, %v85_v22 }
  0x49   :  { %1560 = vmatmul.mubr.msk.f32.gmra.mrb[4].mxu0 %vm106_vm0, %v86_v23 }
  0x4a   :  { %1562 = vmatprep.mubr.msk.f32.mxu0 %vm106_vm0, %v87_v24 }
  0x4b   :  { %1580 = vmatmul.mubr.msk.f32.gmra.mrb[4].mxu1 %vm106_vm0, %v86_v23 }
  0x4c   :  { %1582 = vmatprep.mubr.msk.f32.mxu1 %vm106_vm0, %v87_v24 }
  0x4d   :  { %1563 = vmatmul.mubr.msk.f32.gmra.mrb[6].mxu0 %vm106_vm0, %v88_v25 }
  0x4e   :  { %1593 = vmatprep.mubr.msk.f32.mxu0 %vm106_vm0, %v81_v9 }
  0x4f   :  { %1583 = vmatmul.mubr.msk.f32.gmra.mrb[6].mxu1 %vm106_vm0, %v88_v25 }
  0x51   :  { %1594 = vmatmul.mubr.msk.f32.vlgmr.msra.gmra.mrb[8].mxu0 %vm106_vm0, %v82_v18  ;;  %v2013_v18 = vadd.s32 24, %v1991_v27  ;;  %v1470_v27 = vld [vmem:[%s2251_s6] ss:$0 sm:$0xff] }
  0x52   :  { %1596 = vmatprep.mubr.msk.f32.mxu0 %vm106_vm0, %v83_v19 }
  0x53   :  { %vm101_vm4 = vcmp.ne.s32.totalorder %v2013_v18, 31 }
  0x55   :  { %1597 = vmatmul.mubr.msk.f32.gmra.mrb[10].mxu0 %vm106_vm0, %v84_v21 }
  0x56   :  { %1599 = vmatprep.mubr.msk.f32.mxu0 %vm106_vm0, %v85_v22 }
  0x59   :  { %1600 = vmatmul.mubr.msk.f32.gmra.mrb[12].mxu0 %vm106_vm0, %v86_v23 }
  0x5a   :  { %1602 = vmatprep.mubr.msk.f32.mxu0 %vm106_vm0, %v87_v24 }
  0x5d   :  { %1603 = vmatmul.mubr.msk.f32.gmra.mrb[14].mxu0 %vm106_vm0, %v88_v25 }
 0x114   :  { %v1555_v28 = vpop.f32.mrb[0].mxu0 }
 0x115   :  { %v466_v29 = vrot.slane %v1555_v28, 7  ;;  %v197_v30 = vpop.f32.mrb[1].mxu0 }
 0x116   :  { %v465_v31 = vrot.slane %v197_v30, 7  ;;  %v1575_v32 = vpop.f32.mrb[0].mxu1 }
 0x117   :  { %v307_v33 = vpop.f32.mrb[1].mxu1 }
 0x118   :  { %v1558_v34 = vpop.f32.mrb[2].mxu0  ;;  %v467_v35 = vsel %vm464_vm1, %v465_v31, %v466_v29  ;;  %v488_v36 = vsel %vm464_vm1, 0.0, %v465_v31 }
 0x119   :  { %v470_v37 = vrot.slane %v1558_v34, 7  ;;  %v555_v38 = vadd.f32 %v1575_v32, %v467_v35  ;;  %v207_v39 = vpop.f32.mrb[3].mxu0  ;;  %v530_v40 = vsel %vm94_vm2, %v488_v36, 0.0 }
 0x11a   :  { %v468_v41 = vrot.slane %v207_v39, 7  ;;  %v554_v42 = vadd.f32 %v530_v40, %v307_v33  ;;  %v1578_v43 = vpop.f32.mrb[2].mxu1 }
 0x11b   :  { %v317_v44 = vpop.f32.mrb[3].mxu1 }
 0x11c   :  { %v471_v45 = vsel %vm464_vm1, %v468_v41, %v470_v37  ;;  %v1561_v46 = vpop.f32.mrb[4].mxu0  ;;  %v469_v47 = vsel %vm464_vm1, %v466_v29, %v468_v41 }
 0x11d   :  { %v2000_v48 = vadd.f32 %v1578_v43, %v471_v45  ;;  %v474_v49 = vrot.slane %v1561_v46, 7  ;;  %v556_v50 = vadd.f32 %v469_v47, %v317_v44  ;;  %v217_v51 = vpop.f32.mrb[5].mxu0 }
 0x11e   :  { %v472_v52 = vrot.slane %v217_v51, 7  ;;  %v1581_v53 = vpop.f32.mrb[4].mxu1 }
 0x11f   :  { %v327_v54 = vpop.f32.mrb[5].mxu1 }
 0x120   :  { %v1564_v55 = vpop.f32.mrb[6].mxu0  ;;  %v475_v56 = vsel %vm464_vm1, %v472_v52, %v474_v49  ;;  %v473_v57 = vsel %vm464_vm1, %v470_v37, %v472_v52 }
 0x121   :  { %v478_v58 = vrot.slane %v1564_v55, 7  ;;  %v559_v59 = vadd.f32 %v1581_v53, %v475_v56  ;;  %v227_v60 = vpop.f32.mrb[7].mxu0  ;;  %v534_v61 = vsel %vm94_vm2, %v473_v57, 0.0 }
 0x122   :  { %v476_v62 = vrot.slane %v227_v60, 7  ;;  %v558_v63 = vadd.f32 %v534_v61, %v327_v54  ;;  %v1584_v0 = vpop.f32.mrb[6].mxu1 }
 0x123   :  { %v337_v1 = vpop.f32.mrb[7].mxu1 }
 0x124   :  { %v479_v2 = vsel %vm464_vm1, %v476_v62, %v478_v58  ;;  %v477_v3 = vsel %vm464_vm1, %v474_v49, %v476_v62  ;;  %v1595_v4 = vpop.f32.mrb[8].mxu0 }
 0x125   :  { %v561_v5 = vadd.f32 %v1584_v0, %v479_v2  ;;  %v560_v6 = vadd.f32 %v477_v3, %v337_v1  ;;  %v499_v7 = vrot.slane %v1595_v4, 1  ;;  %v417_v8 = vpop.f32.mrb[9].mxu0 }
 0x126   :  { %v498_v9 = vrot.slane %v417_v8, 1 }
 0x128   :  { %v500_v10 = vsel %vm497_vm3, %v498_v9, %v499_v7  ;;  %v1598_v11 = vpop.f32.mrb[10].mxu0 }
 0x129   :  { %v503_v13 = vrot.slane %v1598_v11, 1  ;;  %v427_v14 = vpop.f32.mrb[11].mxu0  ;;  %v562_v15 = vadd.f32 %v554_v42, %v500_v10 }
 0x12a   :  { %v501_v16 = vrot.slane %v427_v14, 1 }
 0x12b   :  { %v577_v17 = vadd.f32 %v1443_v12, %v562_v15 }
 0x12c   :  { %v502_v19 = vsel %vm497_vm3, %v499_v7, %v501_v16  ;;  %v504_v20 = vsel %vm497_vm3, %v501_v16, %v503_v13  ;;  %v1601_v21 = vpop.f32.mrb[12].mxu0 }
 0x12d   :  { %v507_v22 = vrot.slane %v1601_v21, 1  ;;  %v437_v23 = vpop.f32.mrb[13].mxu0  ;;  %v585_v24 = vmax.f32 %v577_v17, 0.0  ;;  %v564_v25 = vadd.f32 %v556_v50, %v504_v20  ;;  %v563_v26 = vadd.f32 %v555_v38, %v502_v19 }
 0x12e   :  { %v505_v28 = vrot.slane %v437_v23, 1 }
 0x12f   :  { %v593_v29 = vsel %vm106_vm0, %v585_v24, 0.0  ;;  %v579_v30 = vadd.f32 %v1443_v12, %v564_v25  ;;  %v578_v31 = vadd.f32 %v1443_v12, %v563_v26 }
 0x130   :  { %v506_v32 = vsel %vm497_vm3, %v503_v13, %v505_v28  ;;  %v508_v33 = vsel %vm497_vm3, %v505_v28, %v507_v22  ;;  %594 = vadd.xlane.f32.xlu0 %v593_v29  ;;  %v1604_v34 = vpop.f32.mrb[14].mxu0 }
 0x131   :  { %v511_v35 = vrot.slane %v1604_v34, 1  ;;  %v447_v36 = vpop.f32.mrb[15].mxu0  ;;  %v587_v37 = vmax.f32 %v579_v30, 0.0  ;;  %v586_v39 = vmax.f32 %v578_v31, 0.0  ;;  %v566_v40 = vadd.f32 %v558_v63, %v508_v33 }
 0x132   :  { %v509_v41 = vrot.slane %v447_v36, 1  ;;  %v549_v38 = vsel %vm101_vm4, %v506_v32, 0.0 }
 0x133   :  { %v521_v42 = vsel %vm497_vm3, %v511_v35, 0.0  ;;  %v599_v43 = vsel %vm106_vm0, %v587_v37, 0.0  ;;  %v596_v44 = vsel %vm106_vm0, %v586_v39, 0.0  ;;  %v581_v45 = vadd.f32 %v1443_v12, %v566_v40 }
 0x134   :  { %v553_v46 = vsel %vm101_vm4, %v521_v42, 0.0  ;;  %v510_v47 = vsel %vm497_vm3, %v507_v22, %v509_v41  ;;  %v512_v49 = vsel %vm497_vm3, %v509_v41, %v511_v35  ;;  %600 = vadd.xlane.f32.xlu1 %v599_v43  ;;  %597 = vadd.xlane.f32.xlu0 %v596_v44  ;;  %v565_v50 = vadd.f32 %v2000_v48, %v549_v38 }
 0x135   :  { %v569_v51 = vadd.f32 %v561_v5, %v553_v46  ;;  %v589_v52 = vmax.f32 %v581_v45, 0.0  ;;  %v568_v53 = vadd.f32 %v560_v6, %v512_v49  ;;  %v567_v54 = vadd.f32 %v559_v59, %v510_v47  ;;  %v728_v45 = vld [vmem:[#allocation8] sm:$0xff]  ;;  %v729_v46 = vld [vmem:[#allocation8 + $0x8] sm:$0xff] }
 0x136   :  { %v580_v55 = vadd.f32 %v1443_v12, %v565_v50  ;;  %v862_v47 = vld [vmem:[#allocation8 + $0x20] sm:$0xff]  ;;  %v1689_v49 = vpack.c.bf16 %v729_v46, %v728_v45  ;;  %v863_v50 = vld [vmem:[#allocation8 + $0x28] sm:$0xff] }
 0x137   :  { %v605_v56 = vsel %vm106_vm0, %v589_v52, 0.0  ;;  %v583_v57 = vadd.f32 %v1443_v12, %v568_v53  ;;  %v582_v58 = vadd.f32 %v1443_v12, %v567_v54  ;;  %v584_v0 = vadd.f32 %v1443_v12, %v569_v51  ;;  %v731_v53 = vld [vmem:[#allocation8 + $0x18] sm:$0xff]  ;;  %v864_v54 = vld [vmem:[#allocation8 + $0x30] sm:$0xff] }
 0x138   :  { %606 = vadd.xlane.f32.xlu0 %v605_v56  ;;  %v588_v60 = vmax.f32 %v580_v55, 0.0  ;;  %v1697_v51 = vpack.c.bf16 %v863_v50, %v862_v47  ;;  %1690 = vmatprep.subr.bf16.mxu1 %v1689_v49  ;;  %v865_v56 = vld [vmem:[#allocation8 + $0x38] sm:$0xff] }
 0x139   :  { %v591_v61 = vmax.f32 %v583_v57, 0.0  ;;  %v590_v62 = vmax.f32 %v582_v58, 0.0  ;;  %v592_v2 = vmax.f32 %v584_v0, 0.0  ;;  %1692 = vmatpush3.bf16.msra.mxu1 %v1689_v49  ;;  %v1701_v57 = vpack.c.bf16 %v865_v56, %v864_v54  ;;  %v972_v58 = vld [vmem:[#allocation8 + $0x40] sm:$0xff] }
 0x13a   :  { %v602_v63 = vsel %vm106_vm0, %v588_v60, 0.0  ;;  %1698 = vmatprep.subr.bf16.mxu0 %v1697_v51 }
 0x13b   :  { %603 = vadd.xlane.f32.xlu1 %v602_v63  ;;  %v611_v1 = vsel %vm106_vm0, %v591_v61, 0.0  ;;  %v608_v48 = vsel %vm106_vm0, %v590_v62, 0.0  ;;  %v614_v59 = vsel %vm106_vm0, %v592_v2, 0.0  ;;  %1700 = vmatpush3.bf16.msra.mxu0 %v1697_v51 }
 0x13c   :  { %612 = vadd.xlane.f32.xlu0 %v611_v1  ;;  %1702 = vmatprep.subr.bf16.mxu0 %v1701_v57 }
 0x13f   :  { %609 = vadd.xlane.f32.xlu1 %v608_v48  ;;  %1704 = vmatpush3.bf16.msra.mxu0 %v1701_v57 }
 0x143   :  { %615 = vadd.xlane.f32.xlu1 %v614_v59 }
 0x1bd   :  { %v595_v3 = vpop.xlane.xlu0 %594 }
 0x1be   :  { %v618_v4 = vmul.f32 0.03125, %v595_v3 }
 0x1c0   :  { %v2036_v5 = vsub.f32 %v585_v24, %v618_v4 }
 0x1c1   :  { %v601_v6 = vpop.xlane.xlu1 %600  ;;  %v598_v7 = vpop.xlane.xlu0 %597 }
 0x1c2   :  { %v620_v8 = vmul.f32 0.03125, %v601_v6  ;;  %v619_v9 = vmul.f32 0.03125, %v598_v7  ;;  %v634_v10 = vmul.f32 %v2036_v5, %v2036_v5 }
 0x1c4   :  { %v2040_v11 = vsub.f32 %v587_v37, %v620_v8  ;;  %v2042_v12 = vsub.f32 %v586_v39, %v619_v9  ;;  %v642_v13 = vsel %vm106_vm0, %v634_v10, 0.0 }
 0x1c5   :  { %v607_v14 = vpop.xlane.xlu0 %606  ;;  %643 = vadd.xlane.f32.xlu0 %v642_v13 }
 0x1c6   :  { %v622_v15 = vmul.f32 0.03125, %v607_v14  ;;  %v636_v16 = vmul.f32 %v2040_v11, %v2040_v11  ;;  %v635_v17 = vmul.f32 %v2042_v12, %v2042_v12 }
 0x1c8   :  { %v2049_v19 = vsub.f32 %v589_v52, %v622_v15  ;;  %v604_v20 = vpop.xlane.xlu1 %603  ;;  %v648_v21 = vsel %vm106_vm0, %v636_v16, 0.0  ;;  %v645_v22 = vsel %vm106_vm0, %v635_v17, 0.0  ;;  %v730_v52 = vld [vmem:[#allocation8 + $0x10] sm:$0xff]  ;;  %v1444_v17 = vld [vmem:[%s2248_s3] ss:$0 sm:$0xff] }
 0x1c9   :  { %v621_v23 = vmul.f32 0.03125, %v604_v20  ;;  %649 = vadd.xlane.f32.xlu0 %v648_v21  ;;  %v613_v24 = vpop.xlane.xlu0 %612  ;;  %646 = vadd.xlane.f32.xlu1 %v645_v22  ;;  %v1693_v55 = vpack.c.bf16 %v731_v53, %v730_v52 }
 0x1ca   :  { %v624_v25 = vmul.f32 0.03125, %v613_v24  ;;  %v638_v26 = vmul.f32 %v2049_v19, %v2049_v19  ;;  %v1445_v24 = vld [vmem:[%s2249_s4] ss:$0 sm:$0xff] }
 0x1cb   :  { %v2055_v28 = vsub.f32 %v588_v60, %v621_v23  ;;  %1694 = vmatprep.subr.bf16.mxu1 %v1693_v55  ;;  %v973_v60 = vld [vmem:[#allocation8 + $0x48] sm:$0xff] }
 0x1cc   :  { %v2057_v29 = vsub.f32 %v591_v61, %v624_v25  ;;  %v610_v30 = vpop.xlane.xlu1 %609  ;;  %v654_v31 = vsel %vm106_vm0, %v638_v26, 0.0  ;;  %1696 = vmatpush3.bf16.msra.mxu1 %v1693_v55  ;;  %v2076_v61 = vpack.c.bf16 %v973_v60, %v972_v58 }
 0x1cd   :  { %v623_v32 = vmul.f32 0.03125, %v610_v30  ;;  %655 = vadd.xlane.f32.xlu0 %v654_v31  ;;  %v637_v33 = vmul.f32 %v2055_v28, %v2055_v28 }
 0x1ce   :  { %v640_v34 = vmul.f32 %v2057_v29, %v2057_v29  ;;  %1706 = vmatprep.subr.bf16.mxu1 %v2076_v61 }
 0x1cf   :  { %v2064_v35 = vsub.f32 %v590_v62, %v623_v32  ;;  %v651_v36 = vsel %vm106_vm0, %v637_v33, 0.0 }
 0x1d0   :  { %652 = vadd.xlane.f32.xlu1 %v651_v36  ;;  %v616_v37 = vpop.xlane.xlu1 %615  ;;  %v660_v39 = vsel %vm106_vm0, %v640_v34, 0.0 }
 0x1d1   :  { %v625_v40 = vmul.f32 0.03125, %v616_v37  ;;  %661 = vadd.xlane.f32.xlu0 %v660_v39  ;;  %v639_v41 = vmul.f32 %v2064_v35, %v2064_v35 }
 0x1d3   :  { %v2070_v38 = vsub.f32 %v592_v2, %v625_v40  ;;  %v657_v42 = vsel %vm106_vm0, %v639_v41, 0.0 }
 0x1d4   :  { %658 = vadd.xlane.f32.xlu1 %v657_v42  ;;  %v974_v42 = vld [vmem:[#allocation8 + $0x50] sm:$0xff] }
 0x1d5   :  { %v641_v43 = vmul.f32 %v2070_v38, %v2070_v38 }
 0x1d7   :  { %v663_v44 = vsel %vm106_vm0, %v641_v43, 0.0  ;;  %v975_v43 = vld [vmem:[#allocation8 + $0x58] sm:$0xff] }
 0x1d8   :  { %664 = vadd.xlane.f32.xlu1 %v663_v44  ;;  %v1709_v49 = vpack.c.bf16 %v975_v43, %v974_v42 }
 0x252   :  { %v644_v62 = vpop.xlane.xlu0 %643 }
 0x253   :  { %v666_v63 = vmul.f32 0.03125, %v644_v62 }
 0x255   :  { %v674_v0 = vadd.f32 1e-05, %v666_v63 }
 0x256   :  { %v650_v1 = vpop.xlane.xlu0 %649  ;;  %v647_v48 = vpop.xlane.xlu1 %646 }
 0x257   :  { %1722 = vrsqrt.f32 %v674_v0  ;;  %v668_v2 = vmul.f32 0.03125, %v650_v1  ;;  %v667_v59 = vmul.f32 0.03125, %v647_v48 }
 0x259   :  { %v676_v3 = vadd.f32 1e-05, %v668_v2  ;;  %v675_v4 = vadd.f32 1e-05, %v667_v59 }
 0x25a   :  { %v656_v6 = vpop.xlane.xlu0 %655 }
 0x25b   :  { %1724 = vrsqrt.f32 %v676_v3  ;;  %v670_v7 = vmul.f32 0.03125, %v656_v6 }
 0x25c   :  { %1726 = vrsqrt.f32 %v675_v4 }
 0x25d   :  { %v678_v8 = vadd.f32 1e-05, %v670_v7  ;;  %v653_v9 = vpop.xlane.xlu1 %652 }
 0x25e   :  { %v669_v10 = vmul.f32 0.03125, %v653_v9  ;;  %v662_v13 = vpop.xlane.xlu0 %661 }
 0x25f   :  { %1728 = vrsqrt.f32 %v678_v8  ;;  %v672_v14 = vmul.f32 0.03125, %v662_v13 }
 0x260   :  { %v677_v15 = vadd.f32 1e-05, %v669_v10 }
 0x261   :  { %v1723_v16 = vpop.eup %1722  ;;  %v680_v20 = vadd.f32 1e-05, %v672_v14  ;;  %v659_v21 = vpop.xlane.xlu1 %658 }
 0x262   :  { %1730 = vrsqrt.f32 %v677_v15  ;;  %v671_v22 = vmul.f32 0.03125, %v659_v21  ;;  %v690_v23 = vmul.f32 %v1723_v16, %v2036_v5 }
 0x263   :  { %1732 = vrsqrt.f32 %v680_v20 }
 0x264   :  { %v679_v25 = vadd.f32 1e-05, %v671_v22  ;;  %v705_v26 = vmul.f32 %v1444_v17, %v690_v23 }
 0x265   :  { %v1725_v30 = vpop.eup %1724  ;;  %v665_v31 = vpop.xlane.xlu1 %664 }
 0x266   :  { %v1727_v32 = vpop.eup %1726  ;;  %1734 = vrsqrt.f32 %v679_v25  ;;  %v673_v33 = vmul.f32 0.03125, %v665_v31  ;;  %v720_v34 = vadd.f32 %v1445_v24, %v705_v26  ;;  %v692_v36 = vmul.f32 %v1725_v30, %v2040_v11 }
 0x267   :  { %v691_v37 = vmul.f32 %v1727_v32, %v2042_v12 }
 0x268   :  { %v681_v39 = vadd.f32 1e-05, %v673_v33  ;;  %1613 = vmatprep.mubr.msk.f32.mxu1 %vm106_vm0, %v720_v34  ;;  %1633 = vmatprep.mubr.msk.f32.mxu0 %vm106_vm0, %v720_v34  ;;  %v707_v5 = vmul.f32 %v1444_v17, %v692_v36 }
 0x269   :  { %v1729_v40 = vpop.eup %1728  ;;  %v706_v41 = vmul.f32 %v1444_v17, %v691_v37 }
 0x26a   :  { %1736 = vrsqrt.f32 %v681_v39  ;;  %v722_v44 = vadd.f32 %v1445_v24, %v707_v5  ;;  %v694_v45 = vmul.f32 %v1729_v40, %v2049_v19 }
 0x26b   :  { %v721_v46 = vadd.f32 %v1445_v24, %v706_v41 }
 0x26c   :  { %v1731_v47 = vpop.eup %1730  ;;  %v709_v50 = vmul.f32 %v1444_v17, %v694_v45 }
 0x26d   :  { %v1733_v11 = vpop.eup %1732  ;;  %1614 = vmatmul.mubr.msk.f32.vlgmr.msra.gmra.mrb[8].mxu1 %vm106_vm0, %v721_v46  ;;  %1634 = vmatmul.mubr.msk.f32.vlgmr.msra.gmra.mrb[16].mxu0 %vm106_vm0, %v721_v46  ;;  %v693_v12 = vmul.f32 %v1731_v47, %v2055_v28 }
 0x26e   :  { %1616 = vmatprep.mubr.msk.f32.mxu1 %vm106_vm0, %v722_v44  ;;  %1636 = vmatprep.mubr.msk.f32.mxu0 %vm106_vm0, %v722_v44  ;;  %v696_v51 = vmul.f32 %v1733_v11, %v2057_v29  ;;  %v724_v55 = vadd.f32 %v1445_v24, %v709_v50 }
 0x26f   :  { %1708 = vmatpush3.bf16.msra.mxu1 %v2076_v61  ;;  %v708_v19 = vmul.f32 %v1444_v17, %v693_v12 }
 0x270   :  { %v1735_v52 = vpop.eup %1734  ;;  %1710 = vmatprep.subr.bf16.mxu1 %v1709_v49  ;;  %v711_v56 = vmul.f32 %v1444_v17, %v696_v51 }
 0x271   :  { %v723_v53 = vadd.f32 %v1445_v24, %v708_v19  ;;  %v695_v54 = vmul.f32 %v1735_v52, %v2064_v35 }
 0x272   :  { %v726_v60 = vadd.f32 %v1445_v24, %v711_v56 }
 0x273   :  { %1617 = vmatmul.mubr.msk.f32.gmra.mrb[10].mxu1 %vm106_vm0, %v723_v53  ;;  %1637 = vmatmul.mubr.msk.f32.gmra.mrb[18].mxu0 %vm106_vm0, %v723_v53  ;;  %v710_v28 = vmul.f32 %v1444_v17, %v695_v54 }
 0x274   :  { %v1737_v57 = vpop.eup %1736  ;;  %1619 = vmatprep.mubr.msk.f32.mxu1 %vm106_vm0, %v724_v55  ;;  %1639 = vmatprep.mubr.msk.f32.mxu0 %vm106_vm0, %v724_v55 }
 0x275   :  { %v725_v29 = vadd.f32 %v1445_v24, %v710_v28  ;;  %1712 = vmatpush3.bf16.msra.mxu1 %v1709_v49  ;;  %v697_v58 = vmul.f32 %v1737_v57, %v2070_v38 }
 0x277   :  { %1620 = vmatmul.mubr.msk.f32.gmra.mrb[12].mxu1 %vm106_vm0, %v725_v29  ;;  %1640 = vmatmul.mubr.msk.f32.gmra.mrb[20].mxu0 %vm106_vm0, %v725_v29  ;;  %v712_v35 = vmul.f32 %v1444_v17, %v697_v58 }
 0x278   :  { %1622 = vmatprep.mubr.msk.f32.mxu1 %vm106_vm0, %v726_v60  ;;  %1642 = vmatprep.mubr.msk.f32.mxu0 %vm106_vm0, %v726_v60 }
 0x279   :  { %v727_v61 = vadd.f32 %v1445_v24, %v712_v35 }
 0x27b   :  { %1623 = vmatmul.mubr.msk.f32.gmra.mrb[14].mxu1 %vm106_vm0, %v727_v61  ;;  %1643 = vmatmul.mubr.msk.f32.gmra.mrb[22].mxu0 %vm106_vm0, %v727_v61 }
 0x27c   :  { %1653 = vmatprep.mubr.msk.f32.mxu1 %vm106_vm0, %v720_v34 }
 0x27f   :  { %1654 = vmatmul.mubr.msk.f32.vlgmr.msra.gmra.mrb[16].mxu1 %vm106_vm0, %v721_v46 }
 0x280   :  { %1656 = vmatprep.mubr.msk.f32.mxu1 %vm106_vm0, %v722_v44 }
 0x283   :  { %1657 = vmatmul.mubr.msk.f32.gmra.mrb[18].mxu1 %vm106_vm0, %v723_v53 }
 0x284   :  { %1659 = vmatprep.mubr.msk.f32.mxu1 %vm106_vm0, %v724_v55 }
 0x287   :  { %1660 = vmatmul.mubr.msk.f32.gmra.mrb[20].mxu1 %vm106_vm0, %v725_v29 }
 0x288   :  { %1662 = vmatprep.mubr.msk.f32.mxu1 %vm106_vm0, %v726_v60 }
 0x28b   :  { %1663 = vmatmul.mubr.msk.f32.gmra.mrb[22].mxu1 %vm106_vm0, %v727_v61 }
 0x340   :  { %v1615_v38 = vpop.f32.mrb[8].mxu1  ;;  %v1635_v62 = vpop.f32.mrb[16].mxu0 }
 0x341   :  { %v1090_v63 = vrot.slane %v1615_v38, 7  ;;  %v822_v0 = vpop.f32.mrb[9].mxu1  ;;  %v932_v1 = vpop.f32.mrb[17].mxu0 }
 0x342   :  { %v1089_v48 = vrot.slane %v822_v0, 7 }
 0x344   :  { %v1091_v2 = vsel %vm464_vm1, %v1089_v48, %v1090_v63  ;;  %v1112_v59 = vsel %vm464_vm1, 0.0, %v1089_v48 }
 0x345   :  { %v1162_v3 = vadd.f32 %v1635_v62, %v1091_v2  ;;  %v1145_v4 = vsel %vm94_vm2, %v1112_v59, 0.0 }
 0x346   :  { %v1161_v6 = vadd.f32 %v1145_v4, %v932_v1  ;;  %v1618_v7 = vpop.f32.mrb[10].mxu1  ;;  %v1638_v8 = vpop.f32.mrb[18].mxu0 }
 0x347   :  { %v1094_v9 = vrot.slane %v1618_v7, 7  ;;  %v832_v10 = vpop.f32.mrb[11].mxu1  ;;  %v942_v13 = vpop.f32.mrb[19].mxu0 }
 0x348   :  { %v1092_v14 = vrot.slane %v832_v10, 7 }
 0x34a   :  { %v1095_v15 = vsel %vm464_vm1, %v1092_v14, %v1094_v9  ;;  %v1093_v16 = vsel %vm464_vm1, %v1090_v63, %v1092_v14  ;;  %v1621_v17 = vpop.f32.mrb[12].mxu1  ;;  %v1641_v20 = vpop.f32.mrb[20].mxu0 }
 0x34b   :  { %v2124_v21 = vadd.f32 %v1638_v8, %v1095_v15  ;;  %v1163_v22 = vadd.f32 %v1093_v16, %v942_v13  ;;  %v1098_v23 = vrot.slane %v1621_v17, 7  ;;  %v842_v24 = vpop.f32.mrb[13].mxu1  ;;  %v952_v25 = vpop.f32.mrb[21].mxu0 }
 0x34c   :  { %v1096_v26 = vrot.slane %v842_v24, 7 }
 0x34e   :  { %v1099_v30 = vsel %vm464_vm1, %v1096_v26, %v1098_v23  ;;  %v1097_v31 = vsel %vm464_vm1, %v1094_v9, %v1096_v26  ;;  %v1624_v32 = vpop.f32.mrb[14].mxu1  ;;  %v1644_v33 = vpop.f32.mrb[22].mxu0 }
 0x34f   :  { %v1166_v34 = vadd.f32 %v1641_v20, %v1099_v30  ;;  %v1149_v36 = vsel %vm94_vm2, %v1097_v31, 0.0  ;;  %v1102_v37 = vrot.slane %v1624_v32, 7  ;;  %v852_v39 = vpop.f32.mrb[15].mxu1  ;;  %v962_v5 = vpop.f32.mrb[23].mxu0 }
 0x350   :  { %v1165_v40 = vadd.f32 %v1149_v36, %v952_v25  ;;  %v1100_v41 = vrot.slane %v852_v39, 7 }
 0x352   :  { %v1103_v42 = vsel %vm464_vm1, %v1100_v41, %v1102_v37  ;;  %v1101_v43 = vsel %vm464_vm1, %v1098_v23, %v1100_v41  ;;  %v1655_v44 = vpop.f32.mrb[16].mxu1  ;;  %v1853_v41 = vmov 0  }
 0x353   :  { %v1168_v45 = vadd.f32 %v1644_v33, %v1103_v42  ;;  %v1167_v46 = vadd.f32 %v1101_v43, %v962_v5  ;;  %v1122_v47 = vrot.slane %v1655_v44, 1  ;;  %v1042_v49 = vpop.f32.mrb[17].mxu1  ;;  %1721 = vset.pattern.permute.xlu1 %v1853_v41  ;;  %1720 = vset.pattern.permute.xlu0 %v1853_v41 }
 0x354   :  { %v1121_v11 = vrot.slane %v1042_v49, 1 }
 0x356   :  { %v1123_v12 = vsel %vm497_vm3, %v1121_v11, %v1122_v47  ;;  %v1658_v50 = vpop.f32.mrb[18].mxu1 }
 0x357   :  { %v1126_v51 = vrot.slane %v1658_v50, 1  ;;  %v1052_v19 = vpop.f32.mrb[19].mxu1  ;;  %v1169_v52 = vadd.f32 %v1161_v6, %v1123_v12 }
 0x358   :  { %v1124_v53 = vrot.slane %v1052_v19, 1 }
 0x359   :  { %v1184_v54 = vadd.f32 %v1470_v27, %v1169_v52 }
 0x35a   :  { %v1125_v55 = vsel %vm497_vm3, %v1122_v47, %v1124_v53  ;;  %v1127_v56 = vsel %vm497_vm3, %v1124_v53, %v1126_v51  ;;  %v1661_v28 = vpop.f32.mrb[20].mxu1 }
 0x35b   :  { %v1130_v57 = vrot.slane %v1661_v28, 1  ;;  %v1062_v29 = vpop.f32.mrb[21].mxu1  ;;  %v1192_v58 = vmax.f32 %v1184_v54, 0.0  ;;  %v1171_v60 = vadd.f32 %v1163_v22, %v1127_v56  ;;  %v1170_v35 = vadd.f32 %v1162_v3, %v1125_v55 }
 0x35c   :  { %v1128_v61 = vrot.slane %v1062_v29, 1 }
 0x35d   :  { %v1200_v38 = vsel %vm106_vm0, %v1192_v58, 0.0  ;;  %v1186_v62 = vadd.f32 %v1470_v27, %v1171_v60  ;;  %v1185_v63 = vadd.f32 %v1470_v27, %v1170_v35 }
 0x35e   :  { %v1129_v0 = vsel %vm497_vm3, %v1126_v51, %v1128_v61  ;;  %v1131_v1 = vsel %vm497_vm3, %v1128_v61, %v1130_v57  ;;  %1201 = vadd.xlane.f32.xlu0 %v1200_v38  ;;  %v1664_v48 = vpop.f32.mrb[22].mxu1  ;;  %v1335_v38 = vld [vmem:[%s2254_s9 + $0x8] sm:$0xff] }
 0x35f   :  { %v1134_v2 = vrot.slane %v1664_v48, 1  ;;  %v1072_v59 = vpop.f32.mrb[23].mxu1  ;;  %v1194_v4 = vmax.f32 %v1186_v62, 0.0  ;;  %v1193_v6 = vmax.f32 %v1185_v63, 0.0  ;;  %v1173_v7 = vadd.f32 %v1165_v40, %v1131_v1  ;;  %v1336_v62 = vld [vmem:[%s2254_s9 + $0x10] sm:$0xff]  ;;  %v1334_v63 = vld [vmem:[%s2254_s9] sm:$0xff] }
 0x360   :  { %v1132_v8 = vrot.slane %v1072_v59, 1  ;;  %v1156_v3 = vsel %vm101_vm4, %v1129_v0, 0.0 }
 0x361   :  { %v1144_v9 = vsel %vm497_vm3, %v1134_v2, 0.0  ;;  %v1206_v10 = vsel %vm106_vm0, %v1194_v4, 0.0  ;;  %v1203_v13 = vsel %vm106_vm0, %v1193_v6, 0.0  ;;  %v1188_v14 = vadd.f32 %v1470_v27, %v1173_v7 }
 0x362   :  { %v1160_v15 = vsel %vm101_vm4, %v1144_v9, 0.0  ;;  %v1133_v16 = vsel %vm497_vm3, %v1130_v57, %v1132_v8  ;;  %v1135_v17 = vsel %vm497_vm3, %v1132_v8, %v1134_v2  ;;  %1207 = vadd.xlane.f32.xlu0 %v1206_v10  ;;  %1204 = vadd.xlane.f32.xlu1 %v1203_v13  ;;  %v1172_v20 = vadd.f32 %v2124_v21, %v1156_v3 }
 0x363   :  { %v1176_v22 = vadd.f32 %v1168_v45, %v1160_v15  ;;  %v1196_v23 = vmax.f32 %v1188_v14, 0.0  ;;  %v1174_v24 = vadd.f32 %v1166_v34, %v1133_v16  ;;  %v1175_v25 = vadd.f32 %v1167_v46, %v1135_v17  ;;  %v1337_v16 = vld [vmem:[%s2254_s9 + $0x18] sm:$0xff] }
 0x364   :  { %v1187_v26 = vadd.f32 %v1470_v27, %v1172_v20 }
 0x365   :  { %v1212_v30 = vsel %vm106_vm0, %v1196_v23, 0.0  ;;  %v1189_v31 = vadd.f32 %v1470_v27, %v1174_v24  ;;  %v1190_v32 = vadd.f32 %v1470_v27, %v1175_v25  ;;  %v1191_v5 = vadd.f32 %v1470_v27, %v1176_v22 }
 0x366   :  { %1213 = vadd.xlane.f32.xlu0 %v1212_v30  ;;  %v1195_v18 = vmax.f32 %v1187_v26, 0.0 }
 0x367   :  { %v1197_v33 = vmax.f32 %v1189_v31, 0.0  ;;  %v1198_v39 = vmax.f32 %v1190_v32, 0.0  ;;  %v1199_v34 = vmax.f32 %v1191_v5, 0.0 }
 0x368   :  { %v1209_v36 = vsel %vm106_vm0, %v1195_v18, 0.0 }
 0x369   :  { %v1215_v37 = vsel %vm106_vm0, %v1197_v33, 0.0  ;;  %v1218_v21 = vsel %vm106_vm0, %v1198_v39, 0.0  ;;  %v1221_v40 = vsel %vm106_vm0, %v1199_v34, 0.0 }
 0x36a   :  { %1210 = vadd.xlane.f32.xlu0 %v1209_v36  ;;  %1216 = vadd.xlane.f32.xlu1 %v1215_v37 }
 0x36e   :  { %1219 = vadd.xlane.f32.xlu1 %v1218_v21 }
 0x372   :  { %1222 = vadd.xlane.f32.xlu1 %v1221_v40 }
 0x3eb   :  { %v1202_v42 = vpop.xlane.xlu0 %1201 }
 0x3ec   :  { %v1224_v43 = vmul.f32 0.03125, %v1202_v42 }
 0x3ee   :  { %v2156_v44 = vsub.f32 %v1192_v58, %v1224_v43 }
 0x3ef   :  { %v1208_v45 = vpop.xlane.xlu0 %1207  ;;  %v1205_v46 = vpop.xlane.xlu1 %1204 }
 0x3f0   :  { %v1226_v47 = vmul.f32 0.03125, %v1208_v45  ;;  %v1225_v49 = vmul.f32 0.03125, %v1205_v46  ;;  %v1240_v11 = vmul.f32 %v2156_v44, %v2156_v44  ;;  %v1471_v45 = vld [vmem:[%s2252_s7] ss:$0 sm:$0xff] }
 0x3f2   :  { %v2160_v12 = vsub.f32 %v1194_v4, %v1226_v47  ;;  %v2162_v50 = vsub.f32 %v1193_v6, %v1225_v49  ;;  %v1248_v27 = vsel %vm106_vm0, %v1240_v11, 0.0 }
 0x3f3   :  { %v1214_v51 = vpop.xlane.xlu0 %1213  ;;  %1249 = vadd.xlane.f32.xlu0 %v1248_v27 }
 0x3f4   :  { %v1228_v19 = vmul.f32 0.03125, %v1214_v51  ;;  %v1242_v52 = vmul.f32 %v2160_v12, %v2160_v12  ;;  %v1241_v53 = vmul.f32 %v2162_v50, %v2162_v50 }
 0x3f6   :  { %v2169_v54 = vsub.f32 %v1196_v23, %v1228_v19  ;;  %v1254_v55 = vsel %vm106_vm0, %v1242_v52, 0.0  ;;  %v1251_v56 = vsel %vm106_vm0, %v1241_v53, 0.0 }
 0x3f7   :  { %1255 = vadd.xlane.f32.xlu0 %v1254_v55  ;;  %v1211_v28 = vpop.xlane.xlu0 %1210  ;;  %1252 = vadd.xlane.f32.xlu1 %v1251_v56  ;;  %v1217_v0 = vpop.xlane.xlu1 %1216 }
 0x3f8   :  { %v1227_v57 = vmul.f32 0.03125, %v1211_v28  ;;  %v1244_v29 = vmul.f32 %v2169_v54, %v2169_v54  ;;  %v1229_v48 = vmul.f32 0.03125, %v1217_v0 }
 0x3fa   :  { %v2175_v58 = vsub.f32 %v1195_v18, %v1227_v57  ;;  %v1260_v60 = vsel %vm106_vm0, %v1244_v29, 0.0  ;;  %v2190_v2 = vsub.f32 %v1197_v33, %v1229_v48 }
 0x3fb   :  { %1261 = vadd.xlane.f32.xlu0 %v1260_v60  ;;  %v1220_v1 = vpop.xlane.xlu1 %1219 }
 0x3fc   :  { %v1243_v35 = vmul.f32 %v2175_v58, %v2175_v58  ;;  %v1230_v59 = vmul.f32 0.03125, %v1220_v1  ;;  %v1245_v8 = vmul.f32 %v2190_v2, %v2190_v2 }
 0x3fe   :  { %v1257_v61 = vsel %vm106_vm0, %v1243_v35, 0.0  ;;  %v2192_v6 = vsub.f32 %v1198_v39, %v1230_v59  ;;  %v1263_v9 = vsel %vm106_vm0, %v1245_v8, 0.0 }
 0x3ff   :  { %1258 = vadd.xlane.f32.xlu0 %v1257_v61  ;;  %v1223_v4 = vpop.xlane.xlu1 %1222 }
 0x400   :  { %v1231_v7 = vmul.f32 0.03125, %v1223_v4  ;;  %v1246_v10 = vmul.f32 %v2192_v6, %v2192_v6 }
 0x402   :  { %v2196_v3 = vsub.f32 %v1199_v34, %v1231_v7  ;;  %v1266_v13 = vsel %vm106_vm0, %v1246_v10, 0.0 }
 0x404   :  { %v1247_v14 = vmul.f32 %v2196_v3, %v2196_v3 }
 0x406   :  { %v1269_v15 = vsel %vm106_vm0, %v1247_v14, 0.0 }
 0x408   :  { %1345 = vperm.xlu1 %1721, %v1335_v38  }
 0x40c   :  { %1350 = vperm.xlu1 %1721, %v1336_v62  }
 0x415   :  { %1340 = vperm.xlu0 %1720, %v1334_v63  }
 0x430   :  { %1264 = vadd.xlane.f32.xlu1 %v1263_v9 }
 0x434   :  { %1267 = vadd.xlane.f32.xlu1 %v1266_v13 }
 0x438   :  { %1270 = vadd.xlane.f32.xlu1 %v1269_v15 }
 0x449   :  { %1355 = vperm.xlu1 %1721, %v1337_v16  }
 0x480   :  { %v1250_v17 = vpop.xlane.xlu0 %1249 }
 0x481   :  { %v1272_v25 = vmul.f32 0.03125, %v1250_v17 }
 0x483   :  { %v1280_v30 = vadd.f32 1e-05, %v1272_v25 }
 0x484   :  { %v1256_v20 = vpop.xlane.xlu0 %1255  ;;  %v1253_v22 = vpop.xlane.xlu1 %1252 }
 0x485   :  { %v1273_v23 = vmul.f32 0.03125, %v1253_v22  ;;  %v1274_v31 = vmul.f32 0.03125, %v1256_v20 }
 0x487   :  { %v1281_v26 = vadd.f32 1e-05, %v1273_v23  ;;  %v1282_v33 = vadd.f32 1e-05, %v1274_v31 }
 0x488   :  { %v1262_v24 = vpop.xlane.xlu0 %1261  ;;  %v1346_v37 = vpop.permute.xlu1 %1345 }
 0x489   :  { %1738 = vrsqrt.f32 %v1281_v26  ;;  %v1276_v5 = vmul.f32 0.03125, %v1262_v24 }
 0x48a   :  { %1740 = vrsqrt.f32 %v1280_v30 }
 0x48b   :  { %1742 = vrsqrt.f32 %v1282_v33  ;;  %v1284_v40 = vadd.f32 1e-05, %v1276_v5 }
 0x48c   :  { %v1259_v32 = vpop.xlane.xlu0 %1258  ;;  %v1351_v41 = vpop.permute.xlu1 %1350 }
 0x48d   :  { %v1275_v18 = vmul.f32 0.03125, %v1259_v32 }
 0x48f   :  { %v1283_v36 = vadd.f32 1e-05, %v1275_v18 }
 0x491   :  { %1744 = vrsqrt.f32 %v1283_v36 }
 0x492   :  { %1746 = vrsqrt.f32 %v1284_v40 }
 0x493   :  { %v1739_v39 = vpop.eup %1738 }
 0x494   :  { %v1741_v21 = vpop.eup %1740  ;;  %v1297_v34 = vmul.f32 %v1739_v39, %v2162_v50  ;;  %v1472_v50 = vld [vmem:[%s2253_s8] ss:$0 sm:$0xff]  ;;  %v1341_v28 = vpop.permute.xlu0 %1340 }
 0x495   :  { %v1296_v42 = vmul.f32 %v1741_v21, %v2156_v44  ;;  %v1743_v43 = vpop.eup %1742 }
 0x496   :  { %v1312_v46 = vmul.f32 %v1471_v45, %v1297_v34  ;;  %v1298_v49 = vmul.f32 %v1743_v43, %v2160_v12 }
 0x497   :  { %v1311_v11 = vmul.f32 %v1471_v45, %v1296_v42 }
 0x498   :  { %v1327_v19 = vadd.f32 %v1472_v50, %v1312_v46  ;;  %v1313_v53 = vmul.f32 %v1471_v45, %v1298_v49 }
 0x499   :  { %v1326_v55 = vadd.f32 %v1472_v50, %v1311_v11 }
 0x49a   :  { %v1359_v29 = vmul.f32 %v1346_v37, %v1327_v19  ;;  %v1328_v35 = vadd.f32 %v1472_v50, %v1313_v53 }
 0x49b   :  { %v1745_v47 = vpop.eup %1744  ;;  %v1358_v61 = vmul.f32 %v1341_v28, %v1326_v55 }
 0x49c   :  { %v1299_v44 = vmul.f32 %v1745_v47, %v2175_v58  ;;  %v1747_v62 = vpop.eup %1746  ;;  %v1367_v0 = vsel %vm106_vm0, %v1359_v29, 0.0  ;;  %v1360_v58 = vmul.f32 %v1351_v41, %v1328_v35 }
 0x49d   :  { %v1300_v59 = vmul.f32 %v1747_v62, %v2169_v54  ;;  %v1366_v4 = vsel %vm106_vm0, %v1358_v61, 0.0 }
 0x49e   :  { %v1314_v12 = vmul.f32 %v1471_v45, %v1299_v44  ;;  %v1368_v8 = vadd.f32 %v1367_v0, %v1366_v4  ;;  %v1369_v13 = vsel %vm106_vm0, %v1360_v58, 0.0 }
 0x49f   :  { %v1315_v14 = vmul.f32 %v1471_v45, %v1300_v59 }
 0x4a0   :  { %v1329_v48 = vadd.f32 %v1472_v50, %v1314_v12  ;;  %v1370_v17 = vadd.f32 %v1369_v13, %v1368_v8 }
 0x4a1   :  { %v1330_v24 = vadd.f32 %v1472_v50, %v1315_v14 }
 0x4a3   :  { %v1362_v18 = vmul.f32 %v1341_v28, %v1330_v24 }
 0x4a5   :  { %v1379_v34 = vsel %vm106_vm0, %v1362_v18, 0.0 }
 0x4bd   :  { %v1265_v27 = vpop.xlane.xlu1 %1264 }
 0x4be   :  { %v1277_v51 = vmul.f32 0.03125, %v1265_v27 }
 0x4c0   :  { %v1285_v52 = vadd.f32 1e-05, %v1277_v51 }
 0x4c1   :  { %v1268_v56 = vpop.xlane.xlu1 %1267 }
 0x4c2   :  { %1748 = vrsqrt.f32 %v1285_v52  ;;  %v1278_v57 = vmul.f32 0.03125, %v1268_v56 }
 0x4c4   :  { %v1286_v60 = vadd.f32 1e-05, %v1278_v57 }
 0x4c5   :  { %v1271_v38 = vpop.xlane.xlu1 %1270 }
 0x4c6   :  { %1750 = vrsqrt.f32 %v1286_v60  ;;  %v1279_v63 = vmul.f32 0.03125, %v1271_v38 }
 0x4c8   :  { %v1287_v1 = vadd.f32 1e-05, %v1279_v63 }
 0x4c9   :  { %v1356_v7 = vpop.permute.xlu1 %1355 }
 0x4ca   :  { %1752 = vrsqrt.f32 %v1287_v1  ;;  %v1361_v9 = vmul.f32 %v1356_v7, %v1329_v48 }
 0x4cc   :  { %v1749_v10 = vpop.eup %1748  ;;  %v1371_v16 = vsel %vm106_vm0, %v1361_v9, 0.0 }
 0x4cd   :  { %v1301_v15 = vmul.f32 %v1749_v10, %v2190_v2  ;;  %v1372_v23 = vadd.f32 %v1371_v16, %v1370_v17 }
 0x4cf   :  { %v1316_v20 = vmul.f32 %v1471_v45, %v1301_v15  ;;  %v1373_v32 = vrot.slane %v1372_v23, 4 }
 0x4d0   :  { %v1751_v22 = vpop.eup %1750 }
 0x4d1   :  { %v1302_v54 = vmul.f32 %v1751_v22, %v2192_v6  ;;  %v1331_v25 = vadd.f32 %v1472_v50, %v1316_v20  ;;  %v1374_v21 = vadd.f32 %v1373_v32, %v1372_v23 }
 0x4d3   :  { %v1317_v26 = vmul.f32 %v1471_v45, %v1302_v54  ;;  %v1363_v30 = vmul.f32 %v1346_v37, %v1331_v25  ;;  %v1375_v37 = vrot.slane %v1374_v21, 2 }
 0x4d4   :  { %v1753_v31 = vpop.eup %1752 }
 0x4d5   :  { %v1303_v33 = vmul.f32 %v1753_v31, %v2196_v3  ;;  %v1332_v36 = vadd.f32 %v1472_v50, %v1317_v26  ;;  %v1380_v5 = vsel %vm106_vm0, %v1363_v30, 0.0  ;;  %v1376_v11 = vadd.f32 %v1375_v37, %v1374_v21 }
 0x4d6   :  { %v1381_v6 = vadd.f32 %v1380_v5, %v1379_v34 }
 0x4d7   :  { %v1318_v39 = vmul.f32 %v1471_v45, %v1303_v33  ;;  %v1364_v2 = vmul.f32 %v1351_v41, %v1332_v36  ;;  %v1377_v45 = vrot.slane %v1376_v11, 1 }
 0x4d9   :  { %v1333_v40 = vadd.f32 %v1472_v50, %v1318_v39  ;;  %v1382_v42 = vsel %vm106_vm0, %v1364_v2, 0.0  ;;  %v1378_v19 = vadd.f32 %v1377_v45, %v1376_v11  ;;  %v1393_v50 = vstv %s2255_s10 }
 0x4da   :  { %v1383_v46 = vadd.f32 %v1382_v42, %v1381_v6 }
 0x4db   :  { %v1365_v43 = vmul.f32 %v1356_v7, %v1333_v40  ;;  %v1394_v53 = vadd.f32 %v1393_v50, %v1378_v19 }
 0x4dd   :  { %v1384_v47 = vsel %vm106_vm0, %v1365_v43, 0.0 }
 0x4de   :  { %v1385_v49 = vadd.f32 %v1384_v47, %v1383_v46 }
 0x4e0   :  { %v1386_v3 = vrot.slane %v1385_v49, 4 }
 0x4e2   :  { %v1387_v27 = vadd.f32 %v1386_v3, %v1385_v49 }
 0x4e4   :  { %v1388_v41 = vrot.slane %v1387_v27, 2 }
 0x4e6   :  { %v1389_v51 = vadd.f32 %v1388_v41, %v1387_v27 }
 0x4e8   :  { %v1390_v52 = vrot.slane %v1389_v51, 1 }
 0x4ea   :  { %v1391_v44 = vadd.f32 %v1390_v52, %v1389_v51 }
 0x4ec   :  { %v1395_v55 = vadd.f32 %v1393_v50, %v1391_v44 }
 0x4ee   :  { %v1399_v56 = vsel %vm1398_vm5, %v1395_v55, %v1394_v53 }
 0x4ef   :  { %1402 = vst.msk [vmem:[#allocation9] sm:$0x3] %vm1401_vm6, %v1399_v56 }
 0x4f0   :  { %1831 = shalt.err (!%p1828_p0)
}
 0x4f1   :  { %s1832_s10 = scalar_lea.hbm %s2256_s11, 32 }
 0x4f2   :  { %p1833_p1 = scmp.ne.s32.totalorder %s2256_s11, %s1832_s10  ;;  %p1836_p2 = scmp.lt.u32.totalorder %s1832_s10, %s2256_s11 }
 0x4f4   :  { %p1838_p3 = pnand %p1836_p2, %p1833_p1 }
 0x4f6   :  { %1841 = shalt.err (!%p1838_p3)
}
 0x4f7   :  { %1412 = dma.vmem_to_hbm [thread:$0]  %s1410_s13, 32, %s2256_s11, [#allocation5]  }
 0x4f8   :  { %1846 = dma.done.wait [#allocation5], 32  }
 0x4f9   :  { %1847 = vsyncadd [#allocation5], 4294967264 }
 0x4fa   :  { %1416 = vsyncpa [#allocation4], 1 }
 0x4fb   :  { %1417 = vsyncpa [#allocation7], 1 }
 0x4fc   :  { %1418 = vsyncpa [#allocation5], 1 }

</bundles_post_ra>
